<compile_context>
chip_gen: v6e
topology: v6e:2x2x1
jax: 0.10.0
libtpu: 0.0.40
codegen_flags: <defaults>
</compile_context>

<pallas_src>
import functools

import jax
import jax.numpy as jnp
from jax.experimental import pallas as pl
from jax.experimental.pallas import tpu as pltpu
from jax.scipy.special import logsumexp


def znn_kernel(y_ref, z_ref, z0_ref, w_ref, b_ref, out_ref,
               acc_ref, sqv_ref, sqs_ref, *, gamma, k_classes, n_models):
    """Grid: (D // tD,) — a pure reduction over D chunks.

    y_ref  : [B, 1]   int32  labels
    z_ref  : [B, tD]  f32    current D chunk of Z_var
    z0_ref : [B, tD]  f32    current D chunk of Z_var0
    w_ref  : [tD, N]  bf16/f32 fused weights (N = Stheta*K, true width, no pad)
    b_ref  : [1, N]   f32    fused biases
    out_ref: [1, 1]   f32 (SMEM) final -total_loss
    acc_ref: [B, N]   f32 VMEM logits accumulator
    sqv_ref: [B, 128] f32 VMEM lane-wise partial sums of (Z-Z0)^2
    sqs_ref: [1, 1]   f32 SMEM remainder accumulator (only if tD % 128 != 0)
    """
    d = pl.program_id(0)

    @pl.when(d == 0)
    def _init():
        acc_ref[...] = jnp.zeros_like(acc_ref)
        sqv_ref[...] = jnp.zeros_like(sqv_ref)
        sqs_ref[0, 0] = jnp.float32(0.0)

    # ---- fused logits for ALL models at once: [B,tD] @ [tD,N] on the MXU ----
    z = z_ref[...]                                                  # f32
    acc_ref[...] += jnp.dot(z.astype(w_ref.dtype), w_ref[...],
                            preferred_element_type=jnp.float32)

    # ---- regularizer: lane-wise partial sums (no cross-lane reduce in the
    #      hot loop; the single reduce happens in finalize) ----
    diff = z - z0_ref[...]
    dd = diff * diff                                                # [B, tD]
    t_d = dd.shape[1]
    n_full = (t_d // 128) * 128
    part = sqv_ref[...]
    for c in range(0, n_full, 128):                                 # lane-aligned vadds
        part = part + dd[:, c:c + 128]
    sqv_ref[...] = part
    if t_d - n_full:                                                # static; rare tail
        sqs_ref[0, 0] += jnp.sum(dd[:, n_full:])

    @pl.when(d == pl.num_programs(0) - 1)
    def _finalize():
        logits = acc_ref[...] + b_ref[...]                          # [B, N] f32
        bsz = logits.shape[0]
        cls_iota = jax.lax.broadcasted_iota(jnp.int32, (bsz, k_classes), 1)
        picked_mask = cls_iota == y_ref[...]                        # [B, K]

        # Per-model stable log-sum-exp (per-model max) + picked-class logit.
        ce_sum = jnp.zeros((bsz, 1), jnp.float32)
        for j in range(n_models):                                   # static unroll
            lj = logits[:, j * k_classes:(j + 1) * k_classes]       # [B, K]
            mj = jnp.max(lj, axis=-1, keepdims=True)                # [B, 1]
            lse_j = mj + jnp.log(jnp.sum(jnp.exp(lj - mj),
                                         axis=-1, keepdims=True))
            picked_j = jnp.sum(jnp.where(picked_mask, lj, 0.0),
                               axis=-1, keepdims=True)
            ce_sum = ce_sum + (lse_j - picked_j)
        ce_total = jnp.sum(ce_sum) * (1.0 / jnp.float32(bsz))       # sum_i mean_b CE_i

        sq_total = jnp.sum(sqv_ref[...]) + sqs_ref[0, 0]
        total = ce_total - (jnp.float32(n_models) * jnp.float32(gamma)
                            * sq_total)
        out_ref[0, 0] = -total


def _vmem_budgets():
    """(vmem_limit_bytes, per-step pipelined VMEM budget) per TPU generation."""
    try:
        cap = int(pltpu.get_tpu_info().vmem_capacity_bytes)
    except Exception:
        cap = 0
    if cap >= 100 * 1024 * 1024:            # v5e / v6e: 128 MiB physical VMEM
        return 100 * 1024 * 1024, 40 * 1024 * 1024
    # v7x (64 MiB physical) or unknown generation: stay conservative.
    return 48 * 1024 * 1024, 20 * 1024 * 1024


def _pick_d_tile(d_total, batch, n_lanes, w_itemsize, budget_bytes, w_buffers=2):
    """Largest D tile (multiple of 128 dividing D, or D itself) whose pipelined
    per-step VMEM footprint fits the budget.  Sizes the weight block with its
    real dtype itemsize (bf16 halves it vs. f32)."""
    lanes_pad = max(128, ((n_lanes + 127) // 128) * 128)   # physical lane padding
    rows_pad = max(8, ((batch + 7) // 8) * 8)              # physical sublane padding

    def need(tile):
        z_bytes = 2 * 2 * 4 * rows_pad * tile              # z + z0, double-buffered f32
        w_bytes = w_buffers * w_itemsize * tile * lanes_pad
        b_bytes = 2 * 4 * lanes_pad
        scratch = 4 * rows_pad * lanes_pad + 4 * rows_pad * 128
        return z_bytes + w_bytes + b_bytes + scratch

    if d_total % 128 != 0:
        return d_total                                      # only legal tile
    best = 128
    tile = 128
    while tile <= d_total:
        if d_total % tile == 0 and need(tile) <= budget_bytes:
            best = tile
        tile *= 2
    if need(d_total) <= budget_bytes:                       # full extent if it fits
        best = d_total
    return best


def prepare_znn_params(weights, biases, *, mxu_dtype=jnp.bfloat16):
    """Hoisted per-parameter-set work: fuse the Stheta classifiers into the lane
    dimension ([D, Stheta*K], true width, no zero padding) and cast once.
    Call this ONCE per parameter set and reuse across forward calls."""
    s_theta, d_total, k_classes = weights.shape
    w_fused = jnp.transpose(weights, (1, 0, 2)).reshape(
        d_total, s_theta * k_classes).astype(mxu_dtype)
    b_fused = biases.reshape(1, s_theta * k_classes).astype(jnp.float32)
    return w_fused, b_fused


def znn_total_loss_fused(z, z0, y, w_fused, b_fused, gamma, *, n_models,
                         d_block=None, w_buffers=2):
    """z, z0: [B, D] f32; y: [B] int; w_fused: [D, Stheta*K]; b_fused: [1, Stheta*K]."""
    d_total, n_lanes = w_fused.shape
    assert n_lanes % n_models == 0
    k_classes = n_lanes // n_models
    batch = z.shape[0]

    vmem_limit, step_budget = _vmem_budgets()
    if d_block is None:
        d_block = _pick_d_tile(d_total, batch, n_lanes,
                               jnp.dtype(w_fused.dtype).itemsize,
                               step_budget, w_buffers)
    assert d_total % d_block == 0
    assert d_block == d_total or d_block % 128 == 0
    num_d = d_total // d_block

    y2 = y.astype(jnp.int32).reshape(batch, 1)

    kernel = functools.partial(znn_kernel, gamma=float(gamma),
                               k_classes=k_classes, n_models=n_models)

    # Weight stream: the only large per-step transfer; optionally deepen its
    # pipeline (keep default 2 unless a profile shows exposed DMA).
    if w_buffers != 2:
        w_spec = pl.BlockSpec((d_block, n_lanes), lambda d: (d, 0),
                              pipeline_mode=pl.Buffered(w_buffers))
    else:
        w_spec = pl.BlockSpec((d_block, n_lanes), lambda d: (d, 0))

    out = pl.pallas_call(
        kernel,
        out_shape=jax.ShapeDtypeStruct((1, 1), jnp.float32),
        grid_spec=pltpu.PrefetchScalarGridSpec(
            num_scalar_prefetch=0,
            grid=(num_d,),
            in_specs=[
                pl.BlockSpec((batch, 1), lambda d: (0, 0)),            # y
                pl.BlockSpec((batch, d_block), lambda d: (0, d)),      # Z chunk
                pl.BlockSpec((batch, d_block), lambda d: (0, d)),      # Z0 chunk
                w_spec,                                                # fused W chunk
                pl.BlockSpec((1, n_lanes), lambda d: (0, 0)),          # fused bias
            ],
            out_specs=pl.BlockSpec((1, 1), lambda d: (0, 0),
                                   memory_space=pltpu.MemorySpace.SMEM),
            scratch_shapes=[
                pltpu.VMEM((batch, n_lanes), jnp.float32),   # logits accumulator
                pltpu.VMEM((batch, 128), jnp.float32),       # lane-wise sq partials
                pltpu.SMEM((1, 1), jnp.float32),             # sq remainder (tail)
            ],
        ),
        compiler_params=pltpu.CompilerParams(
            dimension_semantics=("arbitrary",),              # D is a reduction
            vmem_limit_bytes=vmem_limit,
        ),
    )(y2, z, z0, w_fused, b_fused)
    return out[0, 0]


def znn_total_loss(z, z0, y, weights, biases, gamma, *,
                   mxu_dtype=jnp.bfloat16, d_block=None, w_buffers=2):
    """Convenience wrapper taking raw stacked params.  For repeated forward
    calls, use prepare_znn_params() once and call znn_total_loss_fused()."""
    w_fused, b_fused = prepare_znn_params(weights, biases, mxu_dtype=mxu_dtype)
    return znn_total_loss_fused(z, z0, y, w_fused, b_fused, gamma,
                                n_models=weights.shape[0],
                                d_block=d_block, w_buffers=w_buffers)


def znn_ref(z, z0, y, weights, biases, gamma):
    """Pure-JAX reference of the PyTorch forward."""
    total = jnp.float32(0.0)
    batch = z.shape[0]
    for i in range(weights.shape[0]):
        logits = z @ weights[i] + biases[i]
        lse = logsumexp(logits, axis=-1)
        picked = logits[jnp.arange(batch), y]
        ce = jnp.mean(lse - picked)
        total = total + ce - gamma * jnp.sum((z - z0) ** 2)
    return -total


if __name__ == "__main__":
    key = jax.random.PRNGKey(0)
    B, C, H, W, K, Stheta = 8, 4, 16, 16, 16, 3
    D = C * H * W                                            # 1024
    gamma = 0.01

    k1, k2, k3, k4, k5 = jax.random.split(key, 5)
    zinput = jax.random.normal(k1, (B, C, H, W), dtype=jnp.float32)            # NCHW
    z_var = zinput + 0.1 * jax.random.normal(k2, (B, C, H, W), jnp.float32)    # nn.Parameter
    y_var = jax.random.randint(k3, (B,), 0, K, dtype=jnp.int32)
    weights = 0.05 * jax.random.normal(k4, (Stheta, D, K), jnp.float32)
    biases = 0.01 * jax.random.normal(k5, (Stheta, K), jnp.float32)

    z = z_var.reshape(B, D)
    z0 = zinput.reshape(B, D)

    ref = znn_ref(z, z0, y_var, weights, biases, gamma)

    # ---- exact f32-MXU path (fused params hoisted once, auto D tile) ----
    w_f32, b_f32 = prepare_znn_params(weights, biases, mxu_dtype=jnp.float32)
    out_f32 = znn_total_loss_fused(z, z0, y_var, w_f32, b_f32, gamma,
                                   n_models=Stheta)
    out_f32 = jax.block_until_ready(out_f32)
    assert jnp.allclose(out_f32, ref, rtol=1e-4, atol=1e-4), (out_f32, ref)

    # ---- bf16-MXU fast path, explicit multi-step D reduction exercised ----
    w_bf16, b_bf16 = prepare_znn_params(weights, biases, mxu_dtype=jnp.bfloat16)
    out_bf16 = znn_total_loss_fused(z, z0, y_var, w_bf16, b_bf16, gamma,
                                    n_models=Stheta, d_block=256)
    out_bf16 = jax.block_until_ready(out_bf16)
    assert jnp.allclose(out_bf16, ref, rtol=2e-2, atol=2e-2), (out_bf16, ref)

    print("KERNEL_OK")
</pallas_src>

<mosaic_0001>
module attributes {stable_mosaic.version = 11 : i64} {
  func.func @znn_kernel(%arg0: i32, %arg1: memref<8x1xi32, #tpu.memory_space<vmem>>, %arg2: memref<8x1024xf32, #tpu.memory_space<vmem>>, %arg3: memref<8x1024xf32, #tpu.memory_space<vmem>>, %arg4: memref<1024x48xf32, #tpu.memory_space<vmem>>, %arg5: memref<1x48xf32, #tpu.memory_space<vmem>>, %arg6: memref<1x1xf32, #tpu.memory_space<smem>>, %arg7: memref<8x48xf32, #tpu.memory_space<vmem>>, %arg8: memref<8x128xf32, #tpu.memory_space<vmem>>, %arg9: memref<1x1xf32, #tpu.memory_space<smem>>) attributes {dimension_semantics = [#tpu.dimension_semantics<arbitrary>], iteration_bounds = array<i64: 1>, scalar_prefetch = 0 : i64, scratch_operands = 3 : i64, tpu.core_type = #tpu.core_type<tc>, window_params = [{pipeline_mode = #tpu.pipeline_mode<synchronous>, transform_indices = @transform_0, window_bounds = array<i64: 8, 1>}, {transform_indices = @transform_1, window_bounds = array<i64: 8, 1024>}, {transform_indices = @transform_2, window_bounds = array<i64: 8, 1024>}, {transform_indices = @transform_3, window_bounds = array<i64: 1024, 48>}, {pipeline_mode = #tpu.pipeline_mode<synchronous>, transform_indices = @transform_4, window_bounds = array<i64: 1, 48>}, {transform_indices = @transform_5, window_bounds = array<i64: 1, 1>}]} {
    %c0_i32 = arith.constant 0 : i32
    %0 = arith.cmpi eq, %arg0, %c0_i32 : i32
    %1 = arith.extui %0 : i1 to i32
    %c0_i32_0 = arith.constant 0 : i32
    %2 = arith.cmpi ne, %1, %c0_i32_0 : i32
    scf.if %2 {
      %cst_16 = arith.constant 0.000000e+00 : f32
      %33 = vector.broadcast %cst_16 : f32 to vector<8x48xf32>
      %c0_17 = arith.constant 0 : index
      %c0_18 = arith.constant 0 : index
      %34 = vector.load %arg7[%c0_17, %c0_18] : memref<8x48xf32, #tpu.memory_space<vmem>>, vector<8x48xf32>
      tpu.vector_store %arg7[%c0_17, %c0_18], %33 {strides = array<i32>} : memref<8x48xf32, #tpu.memory_space<vmem>>, vector<8x48xf32>,
      %cst_19 = arith.constant 0.000000e+00 : f32
      %35 = vector.broadcast %cst_19 : f32 to vector<8x128xf32>
      %c0_20 = arith.constant 0 : index
      %c0_21 = arith.constant 0 : index
      %36 = vector.load %arg8[%c0_20, %c0_21] : memref<8x128xf32, #tpu.memory_space<vmem>>, vector<8x128xf32>
      tpu.vector_store %arg8[%c0_20, %c0_21], %35 {strides = array<i32>} : memref<8x128xf32, #tpu.memory_space<vmem>>, vector<8x128xf32>,
      %cst_22 = arith.constant 0.000000e+00 : f32
      %c0_23 = arith.constant 0 : index
      %c0_24 = arith.constant 0 : index
      %37 = memref.load %arg9[%c0_23, %c0_24] : memref<1x1xf32, #tpu.memory_space<smem>>
      memref.store %cst_22, %arg9[%c0_23, %c0_24] : memref<1x1xf32, #tpu.memory_space<smem>>
    } else {
    }
    %c0 = arith.constant 0 : index
    %c0_1 = arith.constant 0 : index
    %3 = vector.load %arg2[%c0, %c0_1] : memref<8x1024xf32, #tpu.memory_space<vmem>>, vector<8x1024xf32>
    %c0_2 = arith.constant 0 : index
    %c0_3 = arith.constant 0 : index
    %4 = vector.load %arg7[%c0_2, %c0_3] : memref<8x48xf32, #tpu.memory_space<vmem>>, vector<8x48xf32>
    %c0_4 = arith.constant 0 : index
    %c0_5 = arith.constant 0 : index
    %5 = vector.load %arg4[%c0_4, %c0_5] : memref<1024x48xf32, #tpu.memory_space<vmem>>, vector<1024x48xf32>
    %cst = arith.constant dense<0.000000e+00> : vector<8x48xf32>
    %6 = tpu.matmul %3, %5, %cst {dimension_numbers = #tpu.dot_dimension_numbers<[1], [0], [0], [1], [0, 0, 1, 1], [], []>} : vector<8x1024xf32>, vector<1024x48xf32>, vector<8x48xf32> -> vector<8x48xf32>
    %7 = arith.addf %4, %6 : vector<8x48xf32>
    %c0_6 = arith.constant 0 : index
    %c0_7 = arith.constant 0 : index
    %8 = vector.load %arg7[%c0_6, %c0_7] : memref<8x48xf32, #tpu.memory_space<vmem>>, vector<8x48xf32>
    tpu.vector_store %arg7[%c0_6, %c0_7], %7 {strides = array<i32>} : memref<8x48xf32, #tpu.memory_space<vmem>>, vector<8x48xf32>,
    %c0_8 = arith.constant 0 : index
    %c0_9 = arith.constant 0 : index
    %9 = vector.load %arg3[%c0_8, %c0_9] : memref<8x1024xf32, #tpu.memory_space<vmem>>, vector<8x1024xf32>
    %10 = arith.subf %3, %9 : vector<8x1024xf32>
    %11 = arith.mulf %10, %10 : vector<8x1024xf32>
    %c0_10 = arith.constant 0 : index
    %c0_11 = arith.constant 0 : index
    %12 = vector.load %arg8[%c0_10, %c0_11] : memref<8x128xf32, #tpu.memory_space<vmem>>, vector<8x128xf32>
    %13 = vector.extract_strided_slice %11 {offsets = [0, 0], sizes = [8, 128], strides = [1, 1]} : vector<8x1024xf32> to vector<8x128xf32>
    %14 = arith.addf %12, %13 : vector<8x128xf32>
    %15 = vector.extract_strided_slice %11 {offsets = [0, 128], sizes = [8, 128], strides = [1, 1]} : vector<8x1024xf32> to vector<8x128xf32>
    %16 = arith.addf %14, %15 : vector<8x128xf32>
    %17 = vector.extract_strided_slice %11 {offsets = [0, 256], sizes = [8, 128], strides = [1, 1]} : vector<8x1024xf32> to vector<8x128xf32>
    %18 = arith.addf %16, %17 : vector<8x128xf32>
    %19 = vector.extract_strided_slice %11 {offsets = [0, 384], sizes = [8, 128], strides = [1, 1]} : vector<8x1024xf32> to vector<8x128xf32>
    %20 = arith.addf %18, %19 : vector<8x128xf32>
    %21 = vector.extract_strided_slice %11 {offsets = [0, 512], sizes = [8, 128], strides = [1, 1]} : vector<8x1024xf32> to vector<8x128xf32>
    %22 = arith.addf %20, %21 : vector<8x128xf32>
    %23 = vector.extract_strided_slice %11 {offsets = [0, 640], sizes = [8, 128], strides = [1, 1]} : vector<8x1024xf32> to vector<8x128xf32>
    %24 = arith.addf %22, %23 : vector<8x128xf32>
    %25 = vector.extract_strided_slice %11 {offsets = [0, 768], sizes = [8, 128], strides = [1, 1]} : vector<8x1024xf32> to vector<8x128xf32>
    %26 = arith.addf %24, %25 : vector<8x128xf32>
    %27 = vector.extract_strided_slice %11 {offsets = [0, 896], sizes = [8, 128], strides = [1, 1]} : vector<8x1024xf32> to vector<8x128xf32>
    %28 = arith.addf %26, %27 : vector<8x128xf32>
    %c0_12 = arith.constant 0 : index
    %c0_13 = arith.constant 0 : index
    %29 = vector.load %arg8[%c0_12, %c0_13] : memref<8x128xf32, #tpu.memory_space<vmem>>, vector<8x128xf32>
    tpu.vector_store %arg8[%c0_12, %c0_13], %28 {strides = array<i32>} : memref<8x128xf32, #tpu.memory_space<vmem>>, vector<8x128xf32>,
    %c0_i32_14 = arith.constant 0 : i32
    %30 = arith.cmpi eq, %arg0, %c0_i32_14 : i32
    %31 = arith.extui %30 : i1 to i32
    %c0_i32_15 = arith.constant 0 : i32
    %32 = arith.cmpi ne, %31, %c0_i32_15 : i32
    scf.if %32 {
      %c0_16 = arith.constant 0 : index
      %c0_17 = arith.constant 0 : index
      %33 = vector.load %arg7[%c0_16, %c0_17] : memref<8x48xf32, #tpu.memory_space<vmem>>, vector<8x48xf32>
      %c0_18 = arith.constant 0 : index
      %c0_19 = arith.constant 0 : index
      %34 = vector.load %arg5[%c0_18, %c0_19] : memref<1x48xf32, #tpu.memory_space<vmem>>, vector<1x48xf32>
      %35 = vector.broadcast %34 : vector<1x48xf32> to vector<8x48xf32>
      %36 = arith.addf %33, %35 : vector<8x48xf32>
      %37 = tpu.iota {dimensions = array<i32: 1>} : vector<8x16xi32>
      %c0_20 = arith.constant 0 : index
      %c0_21 = arith.constant 0 : index
      %38 = vector.load %arg1[%c0_20, %c0_21] : memref<8x1xi32, #tpu.memory_space<vmem>>, vector<8x1xi32>
      %39 = vector.broadcast %38 : vector<8x1xi32> to vector<8x16xi32>
      %40 = arith.cmpi eq, %37, %39 : vector<8x16xi32>
      %cst_22 = arith.constant 0.000000e+00 : f32
      %41 = vector.broadcast %cst_22 : f32 to vector<8x1xf32>
      %42 = vector.extract_strided_slice %36 {offsets = [0, 0], sizes = [8, 16], strides = [1, 1]} : vector<8x48xf32> to vector<8x16xf32>
      %cst_23 = arith.constant dense<0xFF800000> : vector<8xf32>
      %43 = vector.multi_reduction <maximumf>, %42, %cst_23 [1] : vector<8x16xf32> to vector<8xf32>
      %44 = vector.shape_cast %43 : vector<8xf32> to vector<8x1xf32>
      %45 = vector.broadcast %44 : vector<8x1xf32> to vector<8x16xf32>
      %46 = arith.subf %42, %45 : vector<8x16xf32>
      %47 = math.exp %46 : vector<8x16xf32>
      %cst_24 = arith.constant dense<0.000000e+00> : vector<8xf32>
      %48 = vector.multi_reduction <add>, %47, %cst_24 [1] : vector<8x16xf32> to vector<8xf32>
      %49 = vector.shape_cast %48 : vector<8xf32> to vector<8x1xf32>
      %50 = math.log %49 : vector<8x1xf32>
      %51 = arith.addf %44, %50 : vector<8x1xf32>
      %cst_25 = arith.constant 0.000000e+00 : f32
      %52 = vector.broadcast %cst_25 : f32 to vector<8x16xf32>
      %53 = arith.select %40, %42, %52 : vector<8x16xi1>, vector<8x16xf32>
      %cst_26 = arith.constant dense<0.000000e+00> : vector<8xf32>
      %54 = vector.multi_reduction <add>, %53, %cst_26 [1] : vector<8x16xf32> to vector<8xf32>
      %55 = vector.shape_cast %54 : vector<8xf32> to vector<8x1xf32>
      %56 = arith.subf %51, %55 : vector<8x1xf32>
      %57 = arith.addf %41, %56 : vector<8x1xf32>
      %58 = vector.extract_strided_slice %36 {offsets = [0, 16], sizes = [8, 16], strides = [1, 1]} : vector<8x48xf32> to vector<8x16xf32>
      %cst_27 = arith.constant dense<0xFF800000> : vector<8xf32>
      %59 = vector.multi_reduction <maximumf>, %58, %cst_27 [1] : vector<8x16xf32> to vector<8xf32>
      %60 = vector.shape_cast %59 : vector<8xf32> to vector<8x1xf32>
      %61 = vector.broadcast %60 : vector<8x1xf32> to vector<8x16xf32>
      %62 = arith.subf %58, %61 : vector<8x16xf32>
      %63 = math.exp %62 : vector<8x16xf32>
      %cst_28 = arith.constant dense<0.000000e+00> : vector<8xf32>
      %64 = vector.multi_reduction <add>, %63, %cst_28 [1] : vector<8x16xf32> to vector<8xf32>
      %65 = vector.shape_cast %64 : vector<8xf32> to vector<8x1xf32>
      %66 = math.log %65 : vector<8x1xf32>
      %67 = arith.addf %60, %66 : vector<8x1xf32>
      %cst_29 = arith.constant 0.000000e+00 : f32
      %68 = vector.broadcast %cst_29 : f32 to vector<8x16xf32>
      %69 = arith.select %40, %58, %68 : vector<8x16xi1>, vector<8x16xf32>
      %cst_30 = arith.constant dense<0.000000e+00> : vector<8xf32>
      %70 = vector.multi_reduction <add>, %69, %cst_30 [1] : vector<8x16xf32> to vector<8xf32>
      %71 = vector.shape_cast %70 : vector<8xf32> to vector<8x1xf32>
      %72 = arith.subf %67, %71 : vector<8x1xf32>
      %73 = arith.addf %57, %72 : vector<8x1xf32>
      %74 = vector.extract_strided_slice %36 {offsets = [0, 32], sizes = [8, 16], strides = [1, 1]} : vector<8x48xf32> to vector<8x16xf32>
      %cst_31 = arith.constant dense<0xFF800000> : vector<8xf32>
      %75 = vector.multi_reduction <maximumf>, %74, %cst_31 [1] : vector<8x16xf32> to vector<8xf32>
      %76 = vector.shape_cast %75 : vector<8xf32> to vector<8x1xf32>
      %77 = vector.broadcast %76 : vector<8x1xf32> to vector<8x16xf32>
      %78 = arith.subf %74, %77 : vector<8x16xf32>
      %79 = math.exp %78 : vector<8x16xf32>
      %cst_32 = arith.constant dense<0.000000e+00> : vector<8xf32>
      %80 = vector.multi_reduction <add>, %79, %cst_32 [1] : vector<8x16xf32> to vector<8xf32>
      %81 = vector.shape_cast %80 : vector<8xf32> to vector<8x1xf32>
      %82 = math.log %81 : vector<8x1xf32>
      %83 = arith.addf %76, %82 : vector<8x1xf32>
      %cst_33 = arith.constant 0.000000e+00 : f32
      %84 = vector.broadcast %cst_33 : f32 to vector<8x16xf32>
      %85 = arith.select %40, %74, %84 : vector<8x16xi1>, vector<8x16xf32>
      %cst_34 = arith.constant dense<0.000000e+00> : vector<8xf32>
      %86 = vector.multi_reduction <add>, %85, %cst_34 [1] : vector<8x16xf32> to vector<8xf32>
      %87 = vector.shape_cast %86 : vector<8xf32> to vector<8x1xf32>
      %88 = arith.subf %83, %87 : vector<8x1xf32>
      %89 = arith.addf %73, %88 : vector<8x1xf32>
      %90 = vector.shape_cast %89 : vector<8x1xf32> to vector<1x8x1xf32>
      %cst_35 = arith.constant dense<0.000000e+00> : vector<1xf32>
      %91 = vector.multi_reduction <add>, %90, %cst_35 [1, 2] : vector<1x8x1xf32> to vector<1xf32>
      %92 = vector.shape_cast %91 : vector<1xf32> to vector<1x1x1xf32>
      %93 = vector.extract %92[0, 0, 0] : f32 from vector<1x1x1xf32>
      %cst_36 = arith.constant 1.000000e+00 : f32
      %cst_37 = arith.constant 8.000000e+00 : f32
      %94 = arith.divf %cst_36, %cst_37 : f32
      %95 = arith.mulf %93, %94 : f32
      %c0_38 = arith.constant 0 : index
      %c0_39 = arith.constant 0 : index
      %96 = vector.load %arg8[%c0_38, %c0_39] : memref<8x128xf32, #tpu.memory_space<vmem>>, vector<8x128xf32>
      %97 = vector.shape_cast %96 : vector<8x128xf32> to vector<1x8x128xf32>
      %cst_40 = arith.constant dense<0.000000e+00> : vector<1xf32>
      %98 = vector.multi_reduction <add>, %97, %cst_40 [1, 2] : vector<1x8x128xf32> to vector<1xf32>
      %99 = vector.shape_cast %98 : vector<1xf32> to vector<1x1x1xf32>
      %100 = vector.extract %99[0, 0, 0] : f32 from vector<1x1x1xf32>
      %c0_41 = arith.constant 0 : index
      %c0_42 = arith.constant 0 : index
      %101 = memref.load %arg9[%c0_41, %c0_42] : memref<1x1xf32, #tpu.memory_space<smem>>
      %102 = arith.addf %100, %101 : f32
      %cst_43 = arith.constant 3.000000e+00 : f32
      %cst_44 = arith.constant 0.00999999977 : f32
      %103 = arith.mulf %cst_43, %cst_44 : f32
      %104 = arith.mulf %103, %102 : f32
      %105 = arith.subf %95, %104 : f32
      %cst_45 = arith.constant 0.000000e+00 : f32
      %106 = arith.subf %cst_45, %105 : f32
      %c0_46 = arith.constant 0 : index
      %c0_47 = arith.constant 0 : index
      %107 = memref.load %arg6[%c0_46, %c0_47] : memref<1x1xf32, #tpu.memory_space<smem>>
      memref.store %106, %arg6[%c0_46, %c0_47] : memref<1x1xf32, #tpu.memory_space<smem>>
    } else {
    }
    return
  }
  func.func @transform_0(%arg0: i32) -> (i32, i32) {
    %c0_i32 = arith.constant 0 : i32
    %c0_i32_0 = arith.constant 0 : i32
    %c0_i32_1 = arith.constant 0 : i32
    return %c0_i32, %c0_i32_0 : i32, i32
  }
  func.func @transform_1(%arg0: i32) -> (i32, i32) {
    %c0_i32 = arith.constant 0 : i32
    %c0_i32_0 = arith.constant 0 : i32
    return %c0_i32, %arg0 : i32, i32
  }
  func.func @transform_2(%arg0: i32) -> (i32, i32) {
    %c0_i32 = arith.constant 0 : i32
    %c0_i32_0 = arith.constant 0 : i32
    return %c0_i32, %arg0 : i32, i32
  }
  func.func @transform_3(%arg0: i32) -> (i32, i32) {
    %c0_i32 = arith.constant 0 : i32
    %c0_i32_0 = arith.constant 0 : i32
    return %arg0, %c0_i32 : i32, i32
  }
  func.func @transform_4(%arg0: i32) -> (i32, i32) {
    %c0_i32 = arith.constant 0 : i32
    %c0_i32_0 = arith.constant 0 : i32
    %c0_i32_1 = arith.constant 0 : i32
    return %c0_i32, %c0_i32_0 : i32, i32
  }
  func.func @transform_5(%arg0: i32) -> (i32, i32) {
    %c0_i32 = arith.constant 0 : i32
    %c0_i32_0 = arith.constant 0 : i32
    %c0_i32_1 = arith.constant 0 : i32
    return %c0_i32, %c0_i32_0 : i32, i32
  }
}

</mosaic_0001>

<bundles_post_ra>
// kernel: tpu_custom_call.1
= control target key start
LH: loop header
LB: loop body
LE: loop exit
PB: predicated region body
PF: predicated region fallthrough
CT: control target
= control target key end

     0   :  { %s1306_s0 = inlined_call_operand.vmem [shape: s32[8,1], index: 0, kind: input, shape index: {}]   ;;  %s1307_s1 = inlined_call_operand.vmem [shape: f32[8,1024], index: 1, kind: input, shape index: {}]   ;;  %s1308_s2 = inlined_call_operand.vmem [shape: f32[8,1024], index: 2, kind: input, shape index: {}]   ;;  %s1309_s3 = inlined_call_operand.vmem [shape: f32[1024,48], index: 3, kind: input, shape index: {}]   ;;  %s1310_s4 = inlined_call_operand.vmem [shape: f32[1,48], index: 4, kind: input, shape index: {}]   ;;  %s1311_s5 = inlined_call_operand.hbm [shape: f32[1,1], index: 5, kind: output, shape index: {}]  }
   0x1   :  { %v70_v0 = vld [vmem:[%s1309_s3 + $0xf8] sm:$0xff]  ;;  %v69_v4 = vld [vmem:[%s1309_s3 + $0xf0] sm:$0xff]  ;;  %v68_v8 = vld [vmem:[%s1309_s3 + $0xe8] sm:$0xff] }
   0x2   :  { %v102_v1 = vld [vmem:[%s1309_s3 + $0x1f8] sm:$0xff]  ;;  %618 = vmatprep.subr.mxu0 %v70_v0  ;;  %v101_v5 = vld [vmem:[%s1309_s3 + $0x1f0] sm:$0xff]  ;;  %v100_v9 = vld [vmem:[%s1309_s3 + $0x1e8] sm:$0xff] }
   0x3   :  { %v54_v2 = vld [vmem:[%s1309_s3 + $0x78] sm:$0xff]  ;;  %653 = vmatprep.subr.mxu1 %v102_v1  ;;  %v53_v6 = vld [vmem:[%s1309_s3 + $0x70] sm:$0xff]  ;;  %v52_v10 = vld [vmem:[%s1309_s3 + $0x68] sm:$0xff] }
   0x4   :  { %v86_v3 = vld [vmem:[%s1309_s3 + $0x178] sm:$0xff]  ;;  %619 = vmatpush3.msra.mxu0 %v54_v2  ;;  %v85_v7 = vld [vmem:[%s1309_s3 + $0x170] sm:$0xff]  ;;  %v84_v11 = vld [vmem:[%s1309_s3 + $0x168] sm:$0xff] }
   0x5   :  { %654 = vmatpush3.msra.mxu1 %v86_v3  ;;  %620 = vmatprep.subr.mxu0 %v69_v4  ;;  %v67_v12 = vld [vmem:[%s1309_s3 + $0xe0] sm:$0xff]  ;;  %v66_v16 = vld [vmem:[%s1309_s3 + $0xd8] sm:$0xff]  ;;  %v65_v20 = vld [vmem:[%s1309_s3 + $0xd0] sm:$0xff] }
   0x6   :  { %655 = vmatprep.subr.mxu1 %v101_v5  ;;  %621 = vmatpush3.msra.mxu0 %v53_v6  ;;  %v99_v13 = vld [vmem:[%s1309_s3 + $0x1e0] sm:$0xff]  ;;  %v98_v17 = vld [vmem:[%s1309_s3 + $0x1d8] sm:$0xff]  ;;  %v97_v21 = vld [vmem:[%s1309_s3 + $0x1d0] sm:$0xff] }
   0x7   :  { %656 = vmatpush3.msra.mxu1 %v85_v7  ;;  %622 = vmatprep.subr.mxu0 %v68_v8  ;;  %v51_v14 = vld [vmem:[%s1309_s3 + $0x60] sm:$0xff]  ;;  %v50_v18 = vld [vmem:[%s1309_s3 + $0x58] sm:$0xff]  ;;  %v49_v22 = vld [vmem:[%s1309_s3 + $0x50] sm:$0xff] }
   0x8   :  { %657 = vmatprep.subr.mxu1 %v100_v9  ;;  %v83_v15 = vld [vmem:[%s1309_s3 + $0x160] sm:$0xff]  ;;  %623 = vmatpush3.msra.mxu0 %v52_v10  ;;  %v82_v19 = vld [vmem:[%s1309_s3 + $0x158] sm:$0xff]  ;;  %v81_v23 = vld [vmem:[%s1309_s3 + $0x150] sm:$0xff] }
   0x9   :  { %658 = vmatpush3.msra.mxu1 %v84_v11  ;;  %624 = vmatprep.subr.mxu0 %v67_v12  ;;  %v64_v24 = vld [vmem:[%s1309_s3 + $0xc8] sm:$0xff]  ;;  %v63_v28 = vld [vmem:[%s1309_s3 + $0xc0] sm:$0xff]  ;;  %v62_v32 = vld [vmem:[%s1309_s3 + $0xb8] sm:$0xff] }
   0xa   :  { %659 = vmatprep.subr.mxu1 %v99_v13  ;;  %625 = vmatpush3.msra.mxu0 %v51_v14  ;;  %v96_v25 = vld [vmem:[%s1309_s3 + $0x1c8] sm:$0xff]  ;;  %v95_v29 = vld [vmem:[%s1309_s3 + $0x1c0] sm:$0xff]  ;;  %v94_v33 = vld [vmem:[%s1309_s3 + $0x1b8] sm:$0xff] }
   0xb   :  { %660 = vmatpush3.msra.mxu1 %v83_v15  ;;  %626 = vmatprep.subr.mxu0 %v66_v16  ;;  %v48_v26 = vld [vmem:[%s1309_s3 + $0x48] sm:$0xff]  ;;  %v47_v30 = vld [vmem:[%s1309_s3 + $0x40] sm:$0xff]  ;;  %v46_v34 = vld [vmem:[%s1309_s3 + $0x38] sm:$0xff] }
   0xc   :  { %661 = vmatprep.subr.mxu1 %v98_v17  ;;  %627 = vmatpush3.msra.mxu0 %v50_v18  ;;  %v80_v27 = vld [vmem:[%s1309_s3 + $0x148] sm:$0xff]  ;;  %v79_v31 = vld [vmem:[%s1309_s3 + $0x140] sm:$0xff]  ;;  %v78_v35 = vld [vmem:[%s1309_s3 + $0x138] sm:$0xff] }
   0xd   :  { %662 = vmatpush3.msra.mxu1 %v82_v19  ;;  %628 = vmatprep.subr.mxu0 %v65_v20  ;;  %v61_v36 = vld [vmem:[%s1309_s3 + $0xb0] sm:$0xff]  ;;  %v60_v40 = vld [vmem:[%s1309_s3 + $0xa8] sm:$0xff]  ;;  %v59_v44 = vld [vmem:[%s1309_s3 + $0xa0] sm:$0xff] }
   0xe   :  { %663 = vmatprep.subr.mxu1 %v97_v21  ;;  %629 = vmatpush3.msra.mxu0 %v49_v22  ;;  %v93_v37 = vld [vmem:[%s1309_s3 + $0x1b0] sm:$0xff]  ;;  %v92_v41 = vld [vmem:[%s1309_s3 + $0x1a8] sm:$0xff]  ;;  %v91_v45 = vld [vmem:[%s1309_s3 + $0x1a0] sm:$0xff] }
   0xf   :  { %664 = vmatpush3.msra.mxu1 %v81_v23  ;;  %630 = vmatprep.subr.mxu0 %v64_v24  ;;  %v45_v38 = vld [vmem:[%s1309_s3 + $0x30] sm:$0xff]  ;;  %v44_v42 = vld [vmem:[%s1309_s3 + $0x28] sm:$0xff]  ;;  %v43_v46 = vld [vmem:[%s1309_s3 + $0x20] sm:$0xff] }
  0x10   :  { %665 = vmatprep.subr.mxu1 %v96_v25  ;;  %631 = vmatpush3.msra.mxu0 %v48_v26  ;;  %v77_v39 = vld [vmem:[%s1309_s3 + $0x130] sm:$0xff]  ;;  %v76_v43 = vld [vmem:[%s1309_s3 + $0x128] sm:$0xff]  ;;  %v75_v47 = vld [vmem:[%s1309_s3 + $0x120] sm:$0xff] }
  0x11   :  { %666 = vmatpush3.msra.mxu1 %v80_v27  ;;  %632 = vmatprep.subr.mxu0 %v63_v28  ;;  %v58_v48 = vld [vmem:[%s1309_s3 + $0x98] sm:$0xff]  ;;  %v31_v52 = vld [vmem:[%s1307_s1 + $0x8] sm:$0xff]  ;;  %v30_v57 = vld [vmem:[%s1307_s1] sm:$0xff] }
  0x12   :  { %667 = vmatprep.subr.mxu1 %v95_v29  ;;  %633 = vmatpush3.msra.mxu0 %v47_v30  ;;  %v90_v49 = vld [vmem:[%s1309_s3 + $0x198] sm:$0xff]  ;;  %v451_v53 = vld [vmem:[%s1308_s2 + $0x8] sm:$0xff]  ;;  %v450_v59 = vld [vmem:[%s1308_s2] sm:$0xff] }
  0x13   :  { %668 = vmatpush3.msra.mxu1 %v79_v31  ;;  %634 = vmatprep.subr.mxu0 %v62_v32  ;;  %v42_v50 = vld [vmem:[%s1309_s3 + $0x18] sm:$0xff]  ;;  %v459_v54 = vsub.f32 %v31_v52, %v451_v53  ;;  %v32_v60 = vld [vmem:[%s1307_s1 + $0x10] sm:$0xff]  ;;  %v458_v1 = vsub.f32 %v30_v57, %v450_v59  ;;  %v56_v5 = vld [vmem:[%s1309_s3 + $0x88] sm:$0xff] }
  0x14   :  { %669 = vmatprep.subr.mxu1 %v94_v33  ;;  %635 = vmatpush3.msra.mxu0 %v46_v34  ;;  %v74_v51 = vld [vmem:[%s1309_s3 + $0x118] sm:$0xff]  ;;  %v452_v61 = vld [vmem:[%s1308_s2 + $0x10] sm:$0xff]  ;;  %v88_v6 = vld [vmem:[%s1309_s3 + $0x188] sm:$0xff] }
  0x15   :  { %670 = vmatpush3.msra.mxu1 %v78_v35  ;;  %636 = vmatprep.subr.mxu0 %v61_v36  ;;  %v33_v55 = vld [vmem:[%s1307_s1 + $0x18] sm:$0xff]  ;;  %v57_v62 = vld [vmem:[%s1309_s3 + $0x90] sm:$0xff]  ;;  %v467_v0 = vmul.f32 %v459_v54, %v459_v54  ;;  %v460_v2 = vsub.f32 %v32_v60, %v452_v61  ;;  %v466_v7 = vmul.f32 %v458_v1, %v458_v1  ;;  %v40_v9 = vld [vmem:[%s1309_s3 + $0x8] sm:$0xff] }
  0x16   :  { %671 = vmatprep.subr.mxu1 %v93_v37  ;;  %637 = vmatpush3.msra.mxu0 %v45_v38  ;;  %v453_v56 = vld [vmem:[%s1308_s2 + $0x18] sm:$0xff]  ;;  %v89_v63 = vld [vmem:[%s1309_s3 + $0x190] sm:$0xff]  ;;  %v72_v10 = vld [vmem:[%s1309_s3 + $0x108] sm:$0xff] }
  0x17   :  { %672 = vmatpush3.msra.mxu1 %v77_v39  ;;  %638 = vmatprep.subr.mxu0 %v60_v40  ;;  %v461_v58 = vsub.f32 %v33_v55, %v453_v56  ;;  %v41_v3 = vld [vmem:[%s1309_s3 + $0x10] sm:$0xff]  ;;  %v468_v8 = vmul.f32 %v460_v2, %v460_v2  ;;  %v55_v11 = vld [vmem:[%s1309_s3 + $0x80] sm:$0xff]  ;;  %v476_v14 = vadd.f32 %v467_v0, %v466_v7  ;;  %v134_v19 = vld [vmem:[%s1309_s3 + $0x2f8] sm:$0xff] }
  0x18   :  { %673 = vmatprep.subr.mxu1 %v92_v41  ;;  %639 = vmatpush3.msra.mxu0 %v44_v42  ;;  %v73_v4 = vld [vmem:[%s1309_s3 + $0x110] sm:$0xff]  ;;  %v87_v12 = vld [vmem:[%s1309_s3 + $0x180] sm:$0xff]  ;;  %v166_v20 = vld [vmem:[%s1309_s3 + $0x3f8] sm:$0xff] }
  0x19   :  { %674 = vmatpush3.msra.mxu1 %v76_v43  ;;  %640 = vmatprep.subr.mxu0 %v59_v44  ;;  %v469_v13 = vmul.f32 %v461_v58, %v461_v58  ;;  %v39_v15 = vld [vmem:[%s1309_s3] sm:$0xff]  ;;  %v477_v17 = vadd.f32 %v476_v14, %v468_v8  ;;  %v118_v21 = vld [vmem:[%s1309_s3 + $0x278] sm:$0xff]  ;;  %v133_v23 = vld [vmem:[%s1309_s3 + $0x2f0] sm:$0xff] }
  0x1a   :  { %675 = vmatprep.subr.mxu1 %v91_v45  ;;  %641 = vmatpush3.msra.mxu0 %v43_v46  ;;  %v71_v16 = vld [vmem:[%s1309_s3 + $0x100] sm:$0xff]  ;;  %v150_v22 = vld [vmem:[%s1309_s3 + $0x378] sm:$0xff]  ;;  %v165_v24 = vld [vmem:[%s1309_s3 + $0x3f0] sm:$0xff] }
  0x1b   :  { %676 = vmatpush3.msra.mxu1 %v75_v47  ;;  %642 = vmatprep.subr.mxu0 %v58_v48  ;;  %v1042_v18 = vadd.f32 %v477_v17, %v469_v13  ;;  %v117_v25 = vld [vmem:[%s1309_s3 + $0x270] sm:$0xff]  ;;  %v132_v27 = vld [vmem:[%s1309_s3 + $0x2e8] sm:$0xff]  ;;  %v131_v31 = vld [vmem:[%s1309_s3 + $0x2e0] sm:$0xff] }
  0x1c   :  { %677 = vmatprep.subr.mxu1 %v90_v49  ;;  %643 = vmatpush3.msra.mxu0 %v42_v50  ;;  %v149_v26 = vld [vmem:[%s1309_s3 + $0x370] sm:$0xff]  ;;  %v164_v28 = vld [vmem:[%s1309_s3 + $0x3e8] sm:$0xff]  ;;  %v163_v32 = vld [vmem:[%s1309_s3 + $0x3e0] sm:$0xff] }
  0x1d   :  { %678 = vmatpush3.msra.mxu1 %v74_v51  ;;  %644 = vmatprep.subr.mxu0 %v57_v62  ;;  %v116_v29 = vld [vmem:[%s1309_s3 + $0x268] sm:$0xff]  ;;  %v115_v33 = vld [vmem:[%s1309_s3 + $0x260] sm:$0xff]  ;;  %v130_v35 = vld [vmem:[%s1309_s3 + $0x2d8] sm:$0xff] }
  0x1e   :  { %679 = vmatprep.subr.mxu1 %v89_v63  ;;  %645 = vmatpush3.msra.mxu0 %v41_v3  ;;  %v148_v30 = vld [vmem:[%s1309_s3 + $0x368] sm:$0xff]  ;;  %v147_v34 = vld [vmem:[%s1309_s3 + $0x360] sm:$0xff]  ;;  %v162_v36 = vld [vmem:[%s1309_s3 + $0x3d8] sm:$0xff] }
  0x1f   :  { %680 = vmatpush3.msra.mxu1 %v73_v4  ;;  %646 = vmatprep.subr.mxu0 %v56_v5  ;;  %v114_v37 = vld [vmem:[%s1309_s3 + $0x258] sm:$0xff]  ;;  %v129_v39 = vld [vmem:[%s1309_s3 + $0x2d0] sm:$0xff]  ;;  %v128_v43 = vld [vmem:[%s1309_s3 + $0x2c8] sm:$0xff] }
  0x20   :  { %681 = vmatprep.subr.mxu1 %v88_v6  ;;  %647 = vmatpush3.msra.mxu0 %v40_v9  ;;  %v146_v38 = vld [vmem:[%s1309_s3 + $0x358] sm:$0xff]  ;;  %v161_v40 = vld [vmem:[%s1309_s3 + $0x3d0] sm:$0xff]  ;;  %v160_v44 = vld [vmem:[%s1309_s3 + $0x3c8] sm:$0xff] }
  0x21   :  { %682 = vmatpush3.msra.mxu1 %v72_v10  ;;  %648 = vmatprep.subr.mxu0 %v55_v11  ;;  %v113_v41 = vld [vmem:[%s1309_s3 + $0x250] sm:$0xff]  ;;  %v112_v45 = vld [vmem:[%s1309_s3 + $0x248] sm:$0xff]  ;;  %v127_v47 = vld [vmem:[%s1309_s3 + $0x2c0] sm:$0xff] }
  0x22   :  { %683 = vmatprep.subr.mxu1 %v87_v12  ;;  %649 = vmatpush3.msra.mxu0 %v39_v15  ;;  %v145_v42 = vld [vmem:[%s1309_s3 + $0x350] sm:$0xff]  ;;  %v144_v46 = vld [vmem:[%s1309_s3 + $0x348] sm:$0xff]  ;;  %v159_v48 = vld [vmem:[%s1309_s3 + $0x3c0] sm:$0xff] }
  0x23   :  { %231 = vmatprep.mubr.f32.mxu0 %v31_v52  ;;  %684 = vmatpush3.msra.mxu1 %v71_v16  ;;  %v111_v49 = vld [vmem:[%s1309_s3 + $0x240] sm:$0xff]  ;;  %v126_v53 = vld [vmem:[%s1309_s3 + $0x2b8] sm:$0xff] }
  0x24   :  { %301 = vmatprep.mubr.f32.mxu1 %v33_v55  ;;  %232 = vmatmul.mubr.f32.vlgmr.msra.gmra.mxu0 %v30_v57  ;;  %v143_v50 = vld [vmem:[%s1309_s3 + $0x340] sm:$0xff]  ;;  %v158_v54 = vld [vmem:[%s1309_s3 + $0x3b8] sm:$0xff] }
  0x25   :  { %302 = vmatmul.mubr.f32.vlgmr.msra.gmra.mxu1 %v32_v60  ;;  %688 = vmatprep.subr.mxu0 %v134_v19  ;;  %v1143_v51 = vld [vmem:[%s1307_s1 + $0x20] sm:$0xff] }
  0x26   :  { %723 = vmatprep.subr.mxu1 %v166_v20  ;;  %689 = vmatpush3.msra.mxu0 %v118_v21  ;;  %v454_v52 = vld [vmem:[%s1308_s2 + $0x20] sm:$0xff] }
  0x27   :  { %724 = vmatpush3.msra.mxu1 %v150_v22  ;;  %690 = vmatprep.subr.mxu0 %v133_v23  ;;  %v462_v55 = vsub.f32 %v1143_v51, %v454_v52 }
  0x28   :  { %725 = vmatprep.subr.mxu1 %v165_v24  ;;  %691 = vmatpush3.msra.mxu0 %v117_v25 }
  0x29   :  { %726 = vmatpush3.msra.mxu1 %v149_v26  ;;  %692 = vmatprep.subr.mxu0 %v132_v27 }
  0x2a   :  { %727 = vmatprep.subr.mxu1 %v164_v28  ;;  %693 = vmatpush3.msra.mxu0 %v116_v29 }
  0x2b   :  { %728 = vmatpush3.msra.mxu1 %v148_v30  ;;  %694 = vmatprep.subr.mxu0 %v131_v31 }
  0x2c   :  { %729 = vmatprep.subr.mxu1 %v163_v32  ;;  %695 = vmatpush3.msra.mxu0 %v115_v33 }
  0x2d   :  { %730 = vmatpush3.msra.mxu1 %v147_v34  ;;  %696 = vmatprep.subr.mxu0 %v130_v35 }
  0x2e   :  { %731 = vmatprep.subr.mxu1 %v162_v36  ;;  %697 = vmatpush3.msra.mxu0 %v114_v37 }
  0x2f   :  { %732 = vmatpush3.msra.mxu1 %v146_v38  ;;  %698 = vmatprep.subr.mxu0 %v129_v39 }
  0x30   :  { %733 = vmatprep.subr.mxu1 %v161_v40  ;;  %699 = vmatpush3.msra.mxu0 %v113_v41 }
  0x31   :  { %734 = vmatpush3.msra.mxu1 %v145_v42  ;;  %700 = vmatprep.subr.mxu0 %v128_v43 }
  0x32   :  { %735 = vmatprep.subr.mxu1 %v160_v44  ;;  %701 = vmatpush3.msra.mxu0 %v112_v45 }
  0x33   :  { %736 = vmatpush3.msra.mxu1 %v144_v46 }
  0x34   :  { %10 = vsyncpa [#allocation6], 0  ;;  %702 = vmatprep.subr.mxu0 %v127_v47  ;;  %737 = vmatprep.subr.mxu1 %v159_v48  ;;  %v110_v56 = vld [vmem:[%s1309_s3 + $0x238] sm:$0xff]  ;;  %v125_v58 = vld [vmem:[%s1309_s3 + $0x2b0] sm:$0xff]  ;;  %v470_v60 = vmul.f32 %v462_v55, %v462_v55  ;;  %vm25_vm0 = vcmask 392192   ;;  %v791_v27 = vmov 0.0  }
  0x35   :  { %v142_v57 = vld [vmem:[%s1309_s3 + $0x338] sm:$0xff]  ;;  %703 = vmatpush3.msra.mxu0 %v111_v49  ;;  %738 = vmatpush3.msra.mxu1 %v143_v50  ;;  %v157_v59 = vld [vmem:[%s1309_s3 + $0x3b0] sm:$0xff]  ;;  %v124_v63 = vld [vmem:[%s1309_s3 + $0x2a8] sm:$0xff]  ;;  %26 = vst.msk [vmem:[#allocation2] sm:$0xff] %vm25_vm0, %v791_v27  ;;  %vm522_vm1 = vcmask 261248   ;;  %vm503_vm2 = vcmask 130048  }
  0x36   :  { %704 = vmatprep.subr.mxu0 %v126_v53  ;;  %739 = vmatprep.subr.mxu1 %v158_v54  ;;  %v109_v61 = vld [vmem:[%s1309_s3 + $0x230] sm:$0xff]  ;;  %v156_v0 = vld [vmem:[%s1309_s3 + $0x3a8] sm:$0xff]  ;;  %v1180_v1 = vadd.f32 %v1042_v18, %v470_v60  ;;  %v123_v4 = vld [vmem:[%s1309_s3 + $0x2a0] sm:$0xff]  ;;  %vm549_vm3 = vcmask 392448   ;;  %s794_s27 = smov 96   ;;  %vm575_vm5 = vcmask 7168  }
  0x37   :  { %v141_v62 = vld [vmem:[%s1309_s3 + $0x330] sm:$0xff]  ;;  %705 = vmatpush3.msra.mxu0 %v110_v56  ;;  %740 = vmatpush3.msra.mxu1 %v142_v57  ;;  %v108_v2 = vld [vmem:[%s1309_s3 + $0x228] sm:$0xff]  ;;  %v155_v5 = vld [vmem:[%s1309_s3 + $0x3a0] sm:$0xff]  ;;  %s795_s13 = smov [#allocation5]  }
  0x38   :  { %706 = vmatprep.subr.mxu0 %v125_v58  ;;  %741 = vmatprep.subr.mxu1 %v157_v59  ;;  %v140_v3 = vld [vmem:[%s1309_s3 + $0x328] sm:$0xff]  ;;  %v107_v6 = vld [vmem:[%s1309_s3 + $0x220] sm:$0xff]  ;;  %v122_v8 = vld [vmem:[%s1309_s3 + $0x298] sm:$0xff] }
  0x39   :  { %707 = vmatpush3.msra.mxu0 %v109_v61  ;;  %742 = vmatpush3.msra.mxu1 %v141_v62  ;;  %v139_v7 = vld [vmem:[%s1309_s3 + $0x320] sm:$0xff]  ;;  %v154_v9 = vld [vmem:[%s1309_s3 + $0x398] sm:$0xff]  ;;  %v121_v12 = vld [vmem:[%s1309_s3 + $0x290] sm:$0xff] }
  0x3a   :  { %708 = vmatprep.subr.mxu0 %v124_v63  ;;  %743 = vmatprep.subr.mxu1 %v156_v0  ;;  %v106_v10 = vld [vmem:[%s1309_s3 + $0x218] sm:$0xff]  ;;  %v153_v13 = vld [vmem:[%s1309_s3 + $0x390] sm:$0xff]  ;;  %v120_v16 = vld [vmem:[%s1309_s3 + $0x288] sm:$0xff] }
  0x3b   :  { %709 = vmatpush3.msra.mxu0 %v108_v2  ;;  %744 = vmatpush3.msra.mxu1 %v140_v3  ;;  %v138_v11 = vld [vmem:[%s1309_s3 + $0x318] sm:$0xff]  ;;  %v105_v14 = vld [vmem:[%s1309_s3 + $0x210] sm:$0xff]  ;;  %v152_v17 = vld [vmem:[%s1309_s3 + $0x388] sm:$0xff] }
  0x3c   :  { %710 = vmatprep.subr.mxu0 %v123_v4  ;;  %745 = vmatprep.subr.mxu1 %v155_v5  ;;  %v137_v15 = vld [vmem:[%s1309_s3 + $0x310] sm:$0xff]  ;;  %v104_v18 = vld [vmem:[%s1309_s3 + $0x208] sm:$0xff]  ;;  %v119_v20 = vld [vmem:[%s1309_s3 + $0x280] sm:$0xff] }
  0x3d   :  { %711 = vmatpush3.msra.mxu0 %v107_v6  ;;  %746 = vmatpush3.msra.mxu1 %v139_v7  ;;  %v136_v19 = vld [vmem:[%s1309_s3 + $0x308] sm:$0xff]  ;;  %v151_v21 = vld [vmem:[%s1309_s3 + $0x380] sm:$0xff]  ;;  %v1256_v25 = vld [vmem:[%s1307_s1 + $0x38] sm:$0xff]  ;;  %v496_v7 = vlaneseq }
  0x3e   :  { %712 = vmatprep.subr.mxu0 %v122_v8  ;;  %747 = vmatprep.subr.mxu1 %v154_v9  ;;  %v103_v22 = vld [vmem:[%s1309_s3 + $0x200] sm:$0xff]  ;;  %v1248_v23 = vld [vmem:[%s1307_s1 + $0x28] sm:$0xff]  ;;  %v1261_v26 = vld [vmem:[%s1307_s1 + $0x30] sm:$0xff] }
  0x3f   :  { %713 = vmatpush3.msra.mxu0 %v106_v10  ;;  %748 = vmatpush3.msra.mxu1 %v138_v11  ;;  %v135_v24 = vld [vmem:[%s1309_s3 + $0x300] sm:$0xff]  ;;  %v497_v8 = vand.u32 127, %v496_v7 }
  0x40   :  { %714 = vmatprep.subr.mxu0 %v121_v12  ;;  %749 = vmatprep.subr.mxu1 %v153_v13  ;;  %v38_v42 = vld [vmem:[#allocation2] sm:$0xff]  ;;  %v455_v12 = vld [vmem:[%s1308_s2 + $0x28] sm:$0xff] }
  0x41   :  { %715 = vmatpush3.msra.mxu0 %v105_v14  ;;  %750 = vmatpush3.msra.mxu1 %v137_v15  ;;  %v617_v45 = vld [vmem:[%s1310_s4] ss:$0 sm:$0xff]  ;;  %s793_s4 = smov 112   ;;  %v456_v15 = vld [vmem:[%s1308_s2 + $0x30] sm:$0xff] }
  0x42   :  { %716 = vmatprep.subr.mxu0 %v120_v16  ;;  %751 = vmatprep.subr.mxu1 %v152_v17  ;;  %v498_v59 = vld [vmem:[%s1306_s0] sm:$0xff]  ;;  %v463_v17 = vsub.f32 %v1248_v23, %v455_v12 }
  0x43   :  { %717 = vmatpush3.msra.mxu0 %v104_v18  ;;  %752 = vmatpush3.msra.mxu1 %v136_v19  ;;  %v457_v18 = vld [vmem:[%s1308_s2 + $0x38] sm:$0xff] }
  0x44   :  { %718 = vmatprep.subr.mxu0 %v119_v20  ;;  %753 = vmatprep.subr.mxu1 %v151_v21  ;;  %v464_v20 = vsub.f32 %v1261_v26, %v456_v15  ;;  %v465_v27 = vsub.f32 %v1256_v25, %v457_v18 }
  0x45   :  { %719 = vmatpush3.msra.mxu0 %v103_v22  ;;  %371 = vmatprep.mubr.f32.mxu0 %v1248_v23 }
  0x46   :  { %754 = vmatpush3.msra.mxu1 %v135_v24  ;;  %441 = vmatprep.mubr.f32.mxu1 %v1256_v25  ;;  %v471_v24 = vmul.f32 %v463_v17, %v463_v17 }
  0x47   :  { %372 = vmatmul.mubr.f32.vlgmr.msra.gmra.mxu0 %v1143_v51  ;;  %442 = vmatmul.mubr.f32.vlgmr.msra.gmra.mxu1 %v1261_v26  ;;  %v792_v51 = vmov 0  }
  0x48   :  { %767 = vset.pattern.permute.xlu1 %v792_v51  ;;  %768 = vset.pattern.permute.xlu0 %v792_v51 }
  0xe4   :  { %v650_v28 = vpop.f32.mrf.mxu0 }
  0xe5   :  { %v685_v29 = vpop.f32.mrf.mxu1 }
  0xe6   :  { %v651_v30 = vpop.f32.mrf.mxu0 }
  0xe7   :  { %v686_v31 = vpop.f32.mrf.mxu1  ;;  %v652_v32 = vadd.f32 %v651_v30, %v650_v28  ;;  %v472_v28 = vmul.f32 %v464_v20, %v464_v20  ;;  %v480_v30 = vadd.f32 %v1180_v1, %v471_v24 }
  0xe8   :  { %v687_v33 = vadd.f32 %v686_v31, %v685_v29  ;;  %v473_v29 = vmul.f32 %v465_v27, %v465_v27 }
  0xe9   :  { %v481_v23 = vadd.f32 %v480_v30, %v472_v28 }
  0xea   :  { %v304_v38 = vadd.f32 %v687_v33, %v652_v32 }
  0xeb   :  { %v482_v31 = vadd.f32 %v481_v23, %v473_v29 }
 0x107   :  { %v720_v34 = vpop.f32.mrf.mxu0  ;;  %v755_v35 = vpop.f32.mrf.mxu1 }
 0x109   :  { %v721_v36 = vpop.f32.mrf.mxu0  ;;  %v756_v37 = vpop.f32.mrf.mxu1 }
 0x10a   :  { %v722_v39 = vadd.f32 %v721_v36, %v720_v34  ;;  %v757_v41 = vadd.f32 %v756_v37, %v755_v35 }
 0x10c   :  { %v374_v40 = vadd.f32 %v722_v39, %v304_v38 }
 0x10e   :  { %v444_v43 = vadd.f32 %v757_v41, %v374_v40 }
 0x110   :  { %v447_v44 = vadd.f32 %v444_v43, %v38_v42 }
 0x112   :  { %449 = vst.msk [vmem:[#allocation2] sm:$0xff] %vm25_vm0, %v447_v44 }
 0x119   :  { %v487_v46 = vld [vmem:[#allocation2] sm:$0xff] }
 0x11a   :  { %v495_v47 = vadd.f32 %v617_v45, %v487_v46 }
 0x11c   :  { %v523_v48 = vsel %vm522_vm1, %v495_v47, -inf  ;;  %v504_v49 = vsel %vm503_vm2, %v495_v47, -inf  ;;  %v550_v50 = vsel %vm549_vm3, %v495_v47, -inf }
 0x11d   :  { %524 = vmax.xlane.f32.xlu0 %v523_v48  ;;  %505 = vmax.xlane.f32.xlu1 %v504_v49 }
 0x121   :  { %551 = vmax.xlane.f32.xlu0 %v550_v50 }
 0x1a6   :  { %v1273_v52 = vpop.xlane.xlu0 %524  ;;  %v506_v61 = vpop.xlane.xlu1 %505 }
 0x1a7   :  { %v526_v53 = vsub.f32 %v495_v47, %v1273_v52  ;;  %v507_v62 = vsub.f32 %v495_v47, %v506_v61 }
 0x1a9   :  { %v527_v54 = vmul.f32 1.442695, %v526_v53  ;;  %v508_v63 = vmul.f32 1.442695, %v507_v62 }
 0x1aa   :  { %v1276_v55 = vpop.xlane.xlu0 %551 }
 0x1ab   :  { %769 = vpow2.f32 %v527_v54  ;;  %v553_v56 = vsub.f32 %v495_v47, %v1276_v55 }
 0x1ad   :  { %v554_v57 = vmul.f32 1.442695, %v553_v56 }
 0x1af   :  { %771 = vpow2.f32 %v554_v57 }
 0x1b0   :  { %773 = vpow2.f32 %v508_v63 }
 0x1b8   :  { %v770_v58 = vpop.eup %769 }
 0x1b9   :  { %530 = vrot.lane.b32.xlu1 %v770_v58, %s793_s4 }
 0x1bc   :  { %v772_v60 = vpop.eup %771 }
 0x1bd   :  { %557 = vrot.lane.b32.xlu0 %v772_v60, %s794_s27  ;;  %500 = vperm.xlu1 %767, %v498_v59   ;;  %v774_v0 = vpop.eup %773 }
 0x1be   :  { %v510_v2 = vsel %vm503_vm2, %v774_v0, 0.0 }
 0x1c1   :  { %540 = vrot.lane.b32.xlu1 %v495_v47, %s793_s4 }
 0x1c5   :  { %566 = vrot.lane.b32.xlu1 %v495_v47, %s794_s27 }
 0x1dc   :  { %511 = vadd.xlane.f32.xlu0 %v510_v2 }
 0x22b   :  { %v531_v3 = vpop.permute.xlu1 %530 }
 0x22c   :  { %v533_v4 = vsel %vm503_vm2, %v531_v3, 0.0 }
 0x22d   :  { %534 = vadd.xlane.f32.xlu1 %v533_v4 }
 0x22f   :  { %v558_v5 = vpop.permute.xlu0 %557 }
 0x230   :  { %v560_v6 = vsel %vm503_vm2, %v558_v5, 0.0 }
 0x231   :  { %561 = vadd.xlane.f32.xlu0 %v560_v6 }
 0x238   :  { %v501_v9 = vpop.permute.xlu1 %500 }
 0x239   :  { %vm502_vm4 = vcmp.eq.s32.totalorder %v497_v8, %v501_v9 }
 0x23a   :  { %v516_v10 = vsel %vm502_vm4, %v495_v47, 0.0 }
 0x23b   :  { %v517_v11 = vsel %vm503_vm2, %v516_v10, 0.0 }
 0x23c   :  { %518 = vadd.xlane.f32.xlu0 %v517_v11  ;;  %v541_v13 = vpop.permute.xlu1 %540 }
 0x23d   :  { %v543_v14 = vsel %vm502_vm4, %v541_v13, 0.0 }
 0x23e   :  { %v544_v16 = vsel %vm503_vm2, %v543_v14, 0.0 }
 0x240   :  { %545 = vadd.xlane.f32.xlu0 %v544_v16  ;;  %v567_v19 = vpop.permute.xlu1 %566 }
 0x241   :  { %v569_v21 = vsel %vm502_vm4, %v567_v19, 0.0 }
 0x242   :  { %v570_v22 = vsel %vm503_vm2, %v569_v21, 0.0 }
 0x243   :  { %571 = vadd.xlane.f32.xlu1 %v570_v22 }
 0x247   :  { %588 = vadd.xlane.f32.xlu1 %v482_v31 }
 0x265   :  { %v512_v32 = vpop.xlane.xlu0 %511 }
 0x266   :  { %775 = vlog2.f32 %v512_v32 }
 0x273   :  { %v776_v26 = vpop.eup %775 }
 0x274   :  { %v514_v36 = vmul.f32 0.6931472, %v776_v26 }
 0x276   :  { %v515_v40 = vadd.f32 %v514_v36, %v506_v61 }
 0x2b6   :  { %v535_v33 = vpop.xlane.xlu1 %534 }
 0x2b7   :  { %777 = vlog2.f32 %v535_v33 }
 0x2ba   :  { %v562_v34 = vpop.xlane.xlu0 %561 }
 0x2bb   :  { %779 = vlog2.f32 %v562_v34 }
 0x2c4   :  { %v778_v35 = vpop.eup %777 }
 0x2c5   :  { %v537_v37 = vmul.f32 0.6931472, %v778_v35  ;;  %v519_v38 = vpop.xlane.xlu0 %518 }
 0x2c6   :  { %v520_v42 = vsub.f32 %v515_v40, %v519_v38 }
 0x2c7   :  { %v538_v25 = vadd.f32 %v537_v37, %v1273_v52 }
 0x2c8   :  { %v780_v39 = vpop.eup %779 }
 0x2c9   :  { %v564_v41 = vmul.f32 0.6931472, %v780_v39  ;;  %v546_v1 = vpop.xlane.xlu0 %545 }
 0x2ca   :  { %v547_v43 = vsub.f32 %v538_v25, %v546_v1 }
 0x2cb   :  { %v565_v44 = vadd.f32 %v564_v41, %v1276_v55 }
 0x2cc   :  { %v548_v45 = vadd.f32 %v547_v43, %v520_v42  ;;  %v572_v46 = vpop.xlane.xlu1 %571 }
 0x2cd   :  { %v573_v47 = vsub.f32 %v565_v44, %v572_v46 }
 0x2cf   :  { %v574_v48 = vadd.f32 %v573_v47, %v548_v45 }
 0x2d0   :  { %v589_v50 = vpop.xlane.xlu1 %588 }
 0x2d1   :  { %v576_v49 = vsel %vm575_vm5, %v574_v48, 0.0  ;;  %v590_v51 = vrot.slane %v589_v50, 4 }
 0x2d2   :  { %577 = vadd.xlane.f32.xlu0 %v576_v49 }
 0x2d3   :  { %v591_v53 = vadd.f32 %v590_v51, %v589_v50 }
 0x2d5   :  { %v592_v54 = vrot.slane %v591_v53, 2 }
 0x2d7   :  { %v593_v58 = vadd.f32 %v592_v54, %v591_v53 }
 0x2d9   :  { %v594_v61 = vrot.slane %v593_v58, 1 }
 0x2db   :  { %v595_v63 = vadd.f32 %v594_v61, %v593_v58 }
 0x35b   :  { %v578_v52 = vpop.xlane.xlu0 %577 }
 0x35c   :  { %v579_v56 = vrot.slane %v578_v52, 4 }
 0x35e   :  { %v580_v57 = vadd.f32 %v579_v56, %v578_v52 }
 0x360   :  { %v581_v59 = vrot.slane %v580_v57, 2 }
 0x362   :  { %v582_v60 = vadd.f32 %v581_v59, %v580_v57 }
 0x364   :  { %v583_v62 = vrot.slane %v582_v60, 1 }
 0x366   :  { %v584_v55 = vadd.f32 %v583_v62, %v582_v60 }
 0x368   :  { %758 = vpush %v584_v55 }
 0x369   :  { %760 = vpush %v595_v63 }
 0x399   :  { %s759_s2 = spop %758 }
 0x39a   :  { %s586_s8 = smul.f32 0.125, %s759_s2  ;;  %s761_s9 = spop %760 }
 0x39b   :  { %s599_s10 = smul.f32 0.03, %s761_s9 }
 0x39d   :  { %s600_s11 = ssub.f32 %s586_s8, %s599_s10 }
 0x39f   :  { %s601_s12 = ssub.f32 0.0, %s600_s11 }
 0x3a1   :  { %603 = sst [smem:[#allocation5]] %s601_s12 }
 0x3a2   :  { %611 = dma.smem_to_hbm %s795_s13, 16, %s1311_s5, [#allocation6]  }
 0x3a3   :  { %789 = dma.done.wait [#allocation6], 16  }
 0x3a4   :  { %790 = vsyncadd [#allocation6], 4294967280 }
 0x3a5   :  { %615 = sfence }
 0x3a6   :  { %616 = vsyncpa [#allocation6], 1 }

</bundles_post_ra>
